<compile_context>
chip_gen: v7x
topology: tpu7x:2x2x1
jax: 0.10.0
libtpu: 0.0.40
codegen_flags: <defaults>
</compile_context>

<pallas_src>
import jax
import jax.numpy as jnp
from jax.experimental import pallas as pl
from jax.experimental.pallas import tpu as pltpu

NEG_SLOPE = 0.1  # LeakyReLU slope used by the PyTorch module


# ----------------------------------------------------------------------------
# Host-side (one-time) constant builder — pure weight re-packing glue.
# ----------------------------------------------------------------------------
def _banded_conv_lhs(w_oihw, H2, dtype=jnp.bfloat16):
    """Bake a 3x3 'same' conv into one (3*Cout*H2, Cin*H2) MXU LHS.

    Row block kw (kw in {0,1,2}) holds the banded (Toeplitz-over-H) matrix
        A[kw][o*H2 + i, c*H2 + i'] = w[o, c, i'-i+1, kw]  if |i'-i| <= 1 else 0
    so  A[kw] @ y  is the width-tap-kw contribution for every output column
    (H 'same' padding is handled by the zero band).  No bias column: the bias
    is a VPU broadcast add in-kernel, keeping K = Cin*H2 sublane-aligned.
    """
    Cout, Cin, Kh, Kw = w_oihw.shape
    assert Kh == 3 and Kw == 3, "banded packing assumes a 3x3 kernel"
    i = jnp.arange(H2)
    ip = jnp.arange(H2)
    kh = ip[None, :] - i[:, None] + 1                               # (i, i')
    valid = ((kh >= 0) & (kh < Kh)).astype(jnp.float32)
    kh_c = jnp.clip(kh, 0, Kh - 1)
    w_t = jnp.transpose(w_oihw, (3, 0, 1, 2)).astype(jnp.float32)   # (kw, O, I, kh)
    band = w_t[:, :, :, kh_c] * valid[None, None, None, :, :]       # (kw, O, I, i, i')
    band = jnp.transpose(band, (0, 1, 3, 2, 4))                     # (kw, O, i, I, i')
    return band.reshape(Kw * Cout * H2, Cin * H2).astype(dtype)


# ----------------------------------------------------------------------------
# Public wrapper (NCHW in, NCHW out, PyTorch OIHW weights).
# ----------------------------------------------------------------------------
def down_pallas(x_nchw, w1, b1, w2, b2):
    """x: (N, Cin, H, W); w1: (Cout, Cin, 3, 3); w2: (Cout, Cout, 3, 3); b*: (Cout,)."""
    N, Cin, H, W = x_nchw.shape
    Cout = w1.shape[0]
    assert H % 2 == 0 and W % 2 == 0, "AvgPool2d(2) expects even spatial dims"
    H2, W2 = H // 2, W // 2
    NW2 = N * W2
    out_dtype = x_nchw.dtype

    # ---- wrapper-side layout plumbing (one XLA transpose each way) ----
    # Split the 2x2 pooling window into its 4 taps and fold the batch into
    # the lane axis:  x4[2*dh + dw, c*H2 + i, n*W2 + j] = x[n, c, 2i+dh, 2j+dw]
    x4 = (x_nchw.reshape(N, Cin, H2, 2, W2, 2)
                 .transpose(3, 5, 1, 2, 0, 4)
                 .reshape(4, Cin * H2, NW2))

    # bf16 MXU operands (f32 accumulation in-kernel): fewer MXU passes on
    # v6e/v7x; v5e's MXU is also full-rate bf16.  Epilogue math stays f32.
    a1 = _banded_conv_lhs(w1, H2, jnp.bfloat16)            # (3*Cout*H2, Cin*H2)
    a2 = _banded_conv_lhs(w2, H2, jnp.bfloat16)            # (3*Cout*H2, Cout*H2)
    b1c = jnp.repeat(b1.astype(jnp.float32), H2).reshape(Cout * H2, 1)
    b2c = jnp.repeat(b2.astype(jnp.float32), H2).reshape(Cout * H2, 1)

    # Width-boundary masks over the folded (n, j) lane axis: does column
    # (n, j) have a j-1 / j+1 neighbour inside the SAME image?
    j_idx = jnp.arange(NW2) % W2
    mask_l = (j_idx != 0).astype(jnp.float32).reshape(1, NW2)
    mask_r = (j_idx != W2 - 1).astype(jnp.float32).reshape(1, NW2)

    def kernel(x4_ref, a1_ref, b1_ref, a2_ref, b2_ref, ml_ref, mr_ref, o_ref):
        # ---- 2x2 average pool: three VPU adds over the pre-split taps ----
        pooled = 0.25 * ((x4_ref[0] + x4_ref[1]) + (x4_ref[2] + x4_ref[3]))

        ml = ml_ref[...]                                  # (1, NW2)
        mr = mr_ref[...]

        def conv_lrelu(y_f32, a_ref, b_ref):
            rows = b_ref.shape[0]                         # Cout * H2
            # One MXU matmul per conv: kw taps stacked over LHS rows, the RHS
            # is the plain activation slab (no shifted copies, no concat-built
            # RHS).  bf16 operands, f32 accumulation.
            p = jax.lax.dot_general(
                a_ref[...], y_f32.astype(jnp.bfloat16),
                (((1,), (0,)), ((), ())),
                preferred_element_type=jnp.float32)       # (3*rows, NW2)
            p0 = p[:rows]            # kw=0: contribution needing column j-1
            p1 = p[rows:2 * rows]    # kw=1: contribution of column j
            p2 = p[2 * rows:]        # kw=2: contribution needing column j+1
            # Shift the matmul OUTPUT blocks by one lane (zero column at the
            # edge) and mask image boundaries so folded batch elements never
            # bleed into each other.  (For >=128-lane tiles on real images,
            # use pltpu.roll here so the shift lands on the idle XLU slot.)
            zc = jnp.zeros((rows, 1), jnp.float32)
            p0s = jnp.concatenate([zc, p0[:, :-1]], axis=1)   # value from col-1
            p2s = jnp.concatenate([p2[:, 1:], zc], axis=1)    # value from col+1
            out = p1 + p0s * ml + p2s * mr + b_ref[...]       # VPU bias add
            return jnp.where(out > 0, out, NEG_SLOPE * out)   # LeakyReLU(0.1)

        y1 = conv_lrelu(pooled, a1_ref, b1_ref)
        y2 = conv_lrelu(y1, a2_ref, b2_ref)
        o_ref[...] = y2.astype(o_ref.dtype)

    out2d = pl.pallas_call(
        kernel,
        out_shape=jax.ShapeDtypeStruct((Cout * H2, NW2), out_dtype),
        grid_spec=pltpu.PrefetchScalarGridSpec(
            num_scalar_prefetch=0,
            grid=(1,),   # batch folded into lanes -> one fused step
            in_specs=[
                pl.BlockSpec((4, Cin * H2, NW2), lambda i: (0, 0, 0)),
                pl.BlockSpec((3 * Cout * H2, Cin * H2), lambda i: (0, 0)),
                pl.BlockSpec((Cout * H2, 1), lambda i: (0, 0)),
                pl.BlockSpec((3 * Cout * H2, Cout * H2), lambda i: (0, 0)),
                pl.BlockSpec((Cout * H2, 1), lambda i: (0, 0)),
                pl.BlockSpec((1, NW2), lambda i: (0, 0)),
                pl.BlockSpec((1, NW2), lambda i: (0, 0)),
            ],
            out_specs=pl.BlockSpec((Cout * H2, NW2), lambda i: (0, 0)),
        ),
        compiler_params=pltpu.CompilerParams(
            dimension_semantics=("arbitrary",),
            vmem_limit_bytes=32 * 1024 * 1024,
        ),
    )(x4, a1, b1c, a2, b2c, mask_l, mask_r)

    # Folded (Cout*H2, N*W2) -> NCHW (cheap XLA layout plumbing on the way out).
    return out2d.reshape(Cout, H2, N, W2).transpose(2, 0, 1, 3)


# ----------------------------------------------------------------------------
# Pure-JAX reference (same semantics as the PyTorch module, NCHW / OIHW).
# ----------------------------------------------------------------------------
def down_reference(x_nchw, w1, b1, w2, b2):
    x = x_nchw.astype(jnp.float32)
    N, C, H, W = x.shape
    pooled = x.reshape(N, C, H // 2, 2, W // 2, 2).mean(axis=(3, 5))

    def conv_lrelu(y, w, b):
        out = jax.lax.conv_general_dilated(
            y, w.astype(jnp.float32), window_strides=(1, 1),
            padding=((1, 1), (1, 1)),
            dimension_numbers=("NCHW", "OIHW", "NCHW"))
        out = out + b.reshape(1, -1, 1, 1)
        return jnp.where(out > 0, out, NEG_SLOPE * out)

    y = conv_lrelu(pooled, w1, b1)
    y = conv_lrelu(y, w2, b2)
    return y


if __name__ == "__main__":
    # down(in_ch=4, out_ch=8, kernel_size=3) -> DoubleConv path
    N, Cin, H, W = 2, 4, 16, 16
    Cout = 8

    key = jax.random.PRNGKey(0)
    kx, kw1, kb1, kw2, kb2 = jax.random.split(key, 5)

    x = jax.random.normal(kx, (N, Cin, H, W), dtype=jnp.float32)
    # PyTorch-convention OIHW conv weights.
    w1 = 0.1 * jax.random.normal(kw1, (Cout, Cin, 3, 3), dtype=jnp.float32)
    b1 = 0.1 * jax.random.normal(kb1, (Cout,), dtype=jnp.float32)
    w2 = 0.1 * jax.random.normal(kw2, (Cout, Cout, 3, 3), dtype=jnp.float32)
    b2 = 0.1 * jax.random.normal(kb2, (Cout,), dtype=jnp.float32)

    out = jax.block_until_ready(down_pallas(x, w1, b1, w2, b2))
    ref = jax.block_until_ready(down_reference(x, w1, b1, w2, b2))

    assert out.shape == (N, Cout, H // 2, W // 2), out.shape
    # bf16 MXU operands (f32 accumulation) -> tolerance relaxed vs the f32 ref.
    assert jnp.allclose(out, ref, atol=2e-2, rtol=2e-2), (
        float(jnp.max(jnp.abs(out - ref))))

    print("KERNEL_OK")
</pallas_src>

<mosaic_0001>
module attributes {stable_mosaic.version = 11 : i64} {
  func.func @kernel(%arg0: i32, %arg1: memref<4x32x16xf32, #tpu.memory_space<vmem>>, %arg2: memref<192x32xbf16, #tpu.memory_space<vmem>>, %arg3: memref<64x1xf32, #tpu.memory_space<vmem>>, %arg4: memref<192x64xbf16, #tpu.memory_space<vmem>>, %arg5: memref<64x1xf32, #tpu.memory_space<vmem>>, %arg6: memref<1x16xf32, #tpu.memory_space<vmem>>, %arg7: memref<1x16xf32, #tpu.memory_space<vmem>>, %arg8: memref<64x16xf32, #tpu.memory_space<vmem>>) attributes {dimension_semantics = [#tpu.dimension_semantics<arbitrary>], iteration_bounds = array<i64: 1>, scalar_prefetch = 0 : i64, scratch_operands = 0 : i64, tpu.core_type = #tpu.core_type<tc>, window_params = [{pipeline_mode = #tpu.pipeline_mode<synchronous>, transform_indices = @transform_0, window_bounds = array<i64: 4, 32, 16>}, {pipeline_mode = #tpu.pipeline_mode<synchronous>, transform_indices = @transform_1, window_bounds = array<i64: 192, 32>}, {pipeline_mode = #tpu.pipeline_mode<synchronous>, transform_indices = @transform_2, window_bounds = array<i64: 64, 1>}, {pipeline_mode = #tpu.pipeline_mode<synchronous>, transform_indices = @transform_3, window_bounds = array<i64: 192, 64>}, {pipeline_mode = #tpu.pipeline_mode<synchronous>, transform_indices = @transform_4, window_bounds = array<i64: 64, 1>}, {pipeline_mode = #tpu.pipeline_mode<synchronous>, transform_indices = @transform_5, window_bounds = array<i64: 1, 16>}, {pipeline_mode = #tpu.pipeline_mode<synchronous>, transform_indices = @transform_6, window_bounds = array<i64: 1, 16>}, {pipeline_mode = #tpu.pipeline_mode<synchronous>, transform_indices = @transform_7, window_bounds = array<i64: 64, 16>}]} {
    %c0 = arith.constant 0 : index
    %c0_0 = arith.constant 0 : index
    %c0_1 = arith.constant 0 : index
    %0 = vector.load %arg1[%c0, %c0_0, %c0_1] : memref<4x32x16xf32, #tpu.memory_space<vmem>>, vector<1x32x16xf32>
    %1 = vector.shape_cast %0 : vector<1x32x16xf32> to vector<32x16xf32>
    %c1 = arith.constant 1 : index
    %c0_2 = arith.constant 0 : index
    %c0_3 = arith.constant 0 : index
    %2 = vector.load %arg1[%c1, %c0_2, %c0_3] : memref<4x32x16xf32, #tpu.memory_space<vmem>>, vector<1x32x16xf32>
    %3 = vector.shape_cast %2 : vector<1x32x16xf32> to vector<32x16xf32>
    %4 = arith.addf %1, %3 : vector<32x16xf32>
    %c2 = arith.constant 2 : index
    %c0_4 = arith.constant 0 : index
    %c0_5 = arith.constant 0 : index
    %5 = vector.load %arg1[%c2, %c0_4, %c0_5] : memref<4x32x16xf32, #tpu.memory_space<vmem>>, vector<1x32x16xf32>
    %6 = vector.shape_cast %5 : vector<1x32x16xf32> to vector<32x16xf32>
    %c3 = arith.constant 3 : index
    %c0_6 = arith.constant 0 : index
    %c0_7 = arith.constant 0 : index
    %7 = vector.load %arg1[%c3, %c0_6, %c0_7] : memref<4x32x16xf32, #tpu.memory_space<vmem>>, vector<1x32x16xf32>
    %8 = vector.shape_cast %7 : vector<1x32x16xf32> to vector<32x16xf32>
    %9 = arith.addf %6, %8 : vector<32x16xf32>
    %10 = arith.addf %4, %9 : vector<32x16xf32>
    %cst = arith.constant 2.500000e-01 : f32
    %11 = vector.broadcast %cst : f32 to vector<32x16xf32>
    %12 = arith.mulf %11, %10 : vector<32x16xf32>
    %c0_8 = arith.constant 0 : index
    %c0_9 = arith.constant 0 : index
    %13 = vector.load %arg6[%c0_8, %c0_9] : memref<1x16xf32, #tpu.memory_space<vmem>>, vector<1x16xf32>
    %c0_10 = arith.constant 0 : index
    %c0_11 = arith.constant 0 : index
    %14 = vector.load %arg7[%c0_10, %c0_11] : memref<1x16xf32, #tpu.memory_space<vmem>>, vector<1x16xf32>
    %c0_12 = arith.constant 0 : index
    %c0_13 = arith.constant 0 : index
    %15 = vector.load %arg2[%c0_12, %c0_13] : memref<192x32xbf16, #tpu.memory_space<vmem>>, vector<192x32xbf16>
    %16 = arith.truncf %12 : vector<32x16xf32> to vector<32x16xbf16>
    %cst_14 = arith.constant dense<0.000000e+00> : vector<192x16xf32>
    %17 = tpu.matmul %15, %16, %cst_14 {dimension_numbers = #tpu.dot_dimension_numbers<[1], [0], [0], [1], [0, 0, 1, 1], [], []>} : vector<192x32xbf16>, vector<32x16xbf16>, vector<192x16xf32> -> vector<192x16xf32>
    %18 = vector.extract_strided_slice %17 {offsets = [0, 0], sizes = [64, 16], strides = [1, 1]} : vector<192x16xf32> to vector<64x16xf32>
    %19 = vector.extract_strided_slice %17 {offsets = [64, 0], sizes = [64, 16], strides = [1, 1]} : vector<192x16xf32> to vector<64x16xf32>
    %20 = vector.extract_strided_slice %17 {offsets = [128, 0], sizes = [64, 16], strides = [1, 1]} : vector<192x16xf32> to vector<64x16xf32>
    %cst_15 = arith.constant 0.000000e+00 : f32
    %21 = vector.broadcast %cst_15 : f32 to vector<64x1xf32>
    %22 = vector.extract_strided_slice %18 {offsets = [0, 0], sizes = [64, 15], strides = [1, 1]} : vector<64x16xf32> to vector<64x15xf32>
    %23 = tpu.concatenate %21, %22 in 1 : vector<64x1xf32>, vector<64x15xf32> -> vector<64x16xf32>
    %24 = vector.extract_strided_slice %20 {offsets = [0, 1], sizes = [64, 15], strides = [1, 1]} : vector<64x16xf32> to vector<64x15xf32>
    %25 = tpu.concatenate %24, %21 in 1 : vector<64x15xf32>, vector<64x1xf32> -> vector<64x16xf32>
    %26 = vector.broadcast %13 : vector<1x16xf32> to vector<64x16xf32>
    %27 = arith.mulf %23, %26 : vector<64x16xf32>
    %28 = arith.addf %19, %27 : vector<64x16xf32>
    %29 = vector.broadcast %14 : vector<1x16xf32> to vector<64x16xf32>
    %30 = arith.mulf %25, %29 : vector<64x16xf32>
    %31 = arith.addf %28, %30 : vector<64x16xf32>
    %c0_16 = arith.constant 0 : index
    %c0_17 = arith.constant 0 : index
    %32 = vector.load %arg3[%c0_16, %c0_17] : memref<64x1xf32, #tpu.memory_space<vmem>>, vector<64x1xf32>
    %33 = vector.broadcast %32 : vector<64x1xf32> to vector<64x16xf32>
    %34 = arith.addf %31, %33 : vector<64x16xf32>
    %cst_18 = arith.constant 0.000000e+00 : f32
    %35 = vector.broadcast %cst_18 : f32 to vector<64x16xf32>
    %36 = arith.cmpf ogt, %34, %35 : vector<64x16xf32>
    %cst_19 = arith.constant 1.000000e-01 : f32
    %37 = vector.broadcast %cst_19 : f32 to vector<64x16xf32>
    %38 = arith.mulf %37, %34 : vector<64x16xf32>
    %39 = arith.select %36, %34, %38 : vector<64x16xi1>, vector<64x16xf32>
    %c0_20 = arith.constant 0 : index
    %c0_21 = arith.constant 0 : index
    %40 = vector.load %arg4[%c0_20, %c0_21] : memref<192x64xbf16, #tpu.memory_space<vmem>>, vector<192x64xbf16>
    %41 = arith.truncf %39 : vector<64x16xf32> to vector<64x16xbf16>
    %cst_22 = arith.constant dense<0.000000e+00> : vector<192x16xf32>
    %42 = tpu.matmul %40, %41, %cst_22 {dimension_numbers = #tpu.dot_dimension_numbers<[1], [0], [0], [1], [0, 0, 1, 1], [], []>} : vector<192x64xbf16>, vector<64x16xbf16>, vector<192x16xf32> -> vector<192x16xf32>
    %43 = vector.extract_strided_slice %42 {offsets = [0, 0], sizes = [64, 16], strides = [1, 1]} : vector<192x16xf32> to vector<64x16xf32>
    %44 = vector.extract_strided_slice %42 {offsets = [64, 0], sizes = [64, 16], strides = [1, 1]} : vector<192x16xf32> to vector<64x16xf32>
    %45 = vector.extract_strided_slice %42 {offsets = [128, 0], sizes = [64, 16], strides = [1, 1]} : vector<192x16xf32> to vector<64x16xf32>
    %cst_23 = arith.constant 0.000000e+00 : f32
    %46 = vector.broadcast %cst_23 : f32 to vector<64x1xf32>
    %47 = vector.extract_strided_slice %43 {offsets = [0, 0], sizes = [64, 15], strides = [1, 1]} : vector<64x16xf32> to vector<64x15xf32>
    %48 = tpu.concatenate %46, %47 in 1 : vector<64x1xf32>, vector<64x15xf32> -> vector<64x16xf32>
    %49 = vector.extract_strided_slice %45 {offsets = [0, 1], sizes = [64, 15], strides = [1, 1]} : vector<64x16xf32> to vector<64x15xf32>
    %50 = tpu.concatenate %49, %46 in 1 : vector<64x15xf32>, vector<64x1xf32> -> vector<64x16xf32>
    %51 = vector.broadcast %13 : vector<1x16xf32> to vector<64x16xf32>
    %52 = arith.mulf %48, %51 : vector<64x16xf32>
    %53 = arith.addf %44, %52 : vector<64x16xf32>
    %54 = vector.broadcast %14 : vector<1x16xf32> to vector<64x16xf32>
    %55 = arith.mulf %50, %54 : vector<64x16xf32>
    %56 = arith.addf %53, %55 : vector<64x16xf32>
    %c0_24 = arith.constant 0 : index
    %c0_25 = arith.constant 0 : index
    %57 = vector.load %arg5[%c0_24, %c0_25] : memref<64x1xf32, #tpu.memory_space<vmem>>, vector<64x1xf32>
    %58 = vector.broadcast %57 : vector<64x1xf32> to vector<64x16xf32>
    %59 = arith.addf %56, %58 : vector<64x16xf32>
    %cst_26 = arith.constant 0.000000e+00 : f32
    %60 = vector.broadcast %cst_26 : f32 to vector<64x16xf32>
    %61 = arith.cmpf ogt, %59, %60 : vector<64x16xf32>
    %cst_27 = arith.constant 1.000000e-01 : f32
    %62 = vector.broadcast %cst_27 : f32 to vector<64x16xf32>
    %63 = arith.mulf %62, %59 : vector<64x16xf32>
    %64 = arith.select %61, %59, %63 : vector<64x16xi1>, vector<64x16xf32>
    %c0_28 = arith.constant 0 : index
    %c0_29 = arith.constant 0 : index
    %65 = vector.load %arg8[%c0_28, %c0_29] : memref<64x16xf32, #tpu.memory_space<vmem>>, vector<64x16xf32>
    tpu.vector_store %arg8[%c0_28, %c0_29], %64 {strides = array<i32>} : memref<64x16xf32, #tpu.memory_space<vmem>>, vector<64x16xf32>,
    return
  }
  func.func @transform_0(%arg0: i32) -> (i32, i32, i32) {
    %c0_i32 = arith.constant 0 : i32
    %c0_i32_0 = arith.constant 0 : i32
    %c0_i32_1 = arith.constant 0 : i32
    %c0_i32_2 = arith.constant 0 : i32
    return %c0_i32, %c0_i32_0, %c0_i32_1 : i32, i32, i32
  }
  func.func @transform_1(%arg0: i32) -> (i32, i32) {
    %c0_i32 = arith.constant 0 : i32
    %c0_i32_0 = arith.constant 0 : i32
    %c0_i32_1 = arith.constant 0 : i32
    return %c0_i32, %c0_i32_0 : i32, i32
  }
  func.func @transform_2(%arg0: i32) -> (i32, i32) {
    %c0_i32 = arith.constant 0 : i32
    %c0_i32_0 = arith.constant 0 : i32
    %c0_i32_1 = arith.constant 0 : i32
    return %c0_i32, %c0_i32_0 : i32, i32
  }
  func.func @transform_3(%arg0: i32) -> (i32, i32) {
    %c0_i32 = arith.constant 0 : i32
    %c0_i32_0 = arith.constant 0 : i32
    %c0_i32_1 = arith.constant 0 : i32
    return %c0_i32, %c0_i32_0 : i32, i32
  }
  func.func @transform_4(%arg0: i32) -> (i32, i32) {
    %c0_i32 = arith.constant 0 : i32
    %c0_i32_0 = arith.constant 0 : i32
    %c0_i32_1 = arith.constant 0 : i32
    return %c0_i32, %c0_i32_0 : i32, i32
  }
  func.func @transform_5(%arg0: i32) -> (i32, i32) {
    %c0_i32 = arith.constant 0 : i32
    %c0_i32_0 = arith.constant 0 : i32
    %c0_i32_1 = arith.constant 0 : i32
    return %c0_i32, %c0_i32_0 : i32, i32
  }
  func.func @transform_6(%arg0: i32) -> (i32, i32) {
    %c0_i32 = arith.constant 0 : i32
    %c0_i32_0 = arith.constant 0 : i32
    %c0_i32_1 = arith.constant 0 : i32
    return %c0_i32, %c0_i32_0 : i32, i32
  }
  func.func @transform_7(%arg0: i32) -> (i32, i32) {
    %c0_i32 = arith.constant 0 : i32
    %c0_i32_0 = arith.constant 0 : i32
    %c0_i32_1 = arith.constant 0 : i32
    return %c0_i32, %c0_i32_0 : i32, i32
  }
}

</mosaic_0001>

<bundles_post_ra>
// kernel: tpu_custom_call.1
= control target key start
LH: loop header
LB: loop body
LE: loop exit
PB: predicated region body
PF: predicated region fallthrough
CT: control target
= control target key end

     0   :  { %v1162_v3 = vmov 0   ;;  %vm150_vm0 = vcmask 261120   ;;  %s1163_s21 = smov 1   ;;  %vm610_vm1 = vcmask 523264   ;;  %vm348_vm2 = vcmask 7168   ;;  %s1601_s0 = inlined_call_operand.vmem [shape: f32[4,32,16], index: 0, kind: input, shape index: {}]   ;;  %s1602_s1 = inlined_call_operand.vmem [shape: bf16[192,32], index: 1, kind: input, shape index: {}]   ;;  %s1603_s2 = inlined_call_operand.vmem [shape: f32[64,1], index: 2, kind: input, shape index: {}]   ;;  %s1604_s4 = inlined_call_operand.vmem [shape: f32[64,1], index: 4, kind: input, shape index: {}]   ;;  %s1605_s3 = inlined_call_operand.vmem [shape: bf16[192,64], index: 3, kind: input, shape index: {}]   ;;  %s1606_s5 = inlined_call_operand.vmem [shape: f32[1,16], index: 5, kind: input, shape index: {}]   ;;  %s1607_s6 = inlined_call_operand.vmem [shape: f32[1,16], index: 6, kind: input, shape index: {}]   ;;  %s1608_s7 = inlined_call_operand.vmem [shape: f32[64,16], index: 7, kind: output, shape index: {}]  }
   0x1   :  { %v27_v0 = vld [vmem:[%s1601_s0] sm:$0xff]  ;;  %v28_v1 = vld [vmem:[%s1601_s0 + $0x8] sm:$0xff]  ;;  %1136 = vset.pattern.permute.xlu1 %v1162_v3  ;;  %1137 = vset.pattern.permute.xlu0 %v1162_v3  ;;  %v29_v11 = vld [vmem:[%s1601_s0 + $0x10] sm:$0xff]  ;;  %vm389_vm3 = vcmask 121856   ;;  %vm968_vm12 = vcmask 130048  }
   0x2   :  { %v981_v2 = vld [vmem:[%s1601_s0 + $0x20] sm:$0xff]  ;;  %v982_v4 = vld [vmem:[%s1601_s0 + $0x28] sm:$0xff]  ;;  %v30_v14 = vld [vmem:[%s1601_s0 + $0x18] sm:$0xff] }
   0x3   :  { %v36_v5 = vadd.f32 %v981_v2, %v27_v0  ;;  %v985_v6 = vld [vmem:[%s1601_s0 + $0x40] sm:$0xff]  ;;  %v986_v7 = vld [vmem:[%s1601_s0 + $0x48] sm:$0xff]  ;;  %v37_v8 = vadd.f32 %v982_v4, %v28_v1  ;;  %v983_v15 = vld [vmem:[%s1601_s0 + $0x30] sm:$0xff] }
   0x4   :  { %v989_v9 = vld [vmem:[%s1601_s0 + $0x60] sm:$0xff]  ;;  %v990_v10 = vld [vmem:[%s1601_s0 + $0x68] sm:$0xff]  ;;  %v984_v16 = vld [vmem:[%s1601_s0 + $0x38] sm:$0xff]  ;;  %v38_v17 = vadd.f32 %v983_v15, %v29_v11 }
   0x5   :  { %v50_v12 = vadd.f32 %v989_v9, %v985_v6  ;;  %v51_v13 = vadd.f32 %v990_v10, %v986_v7  ;;  %v39_v18 = vadd.f32 %v984_v16, %v30_v14  ;;  %v987_v19 = vld [vmem:[%s1601_s0 + $0x50] sm:$0xff]  ;;  %v988_v20 = vld [vmem:[%s1601_s0 + $0x58] sm:$0xff]  ;;  %v1138_v27 = vld [vmem:[%s1602_s1] sm:$0xff]  }
   0x6   :  { %v991_v21 = vld [vmem:[%s1601_s0 + $0x70] sm:$0xff]  ;;  %v992_v24 = vld [vmem:[%s1601_s0 + $0x78] sm:$0xff]  ;;  %1077 = vmatprep.mubr.msk.bf16.mxu0 %vm150_vm0, %v1138_v27  ;;  %v1139_v36 = vld [vmem:[%s1602_s1 + $0x8] sm:$0xff]  }
   0x7   :  { %v54_v22 = vadd.f32 %v50_v12, %v36_v5  ;;  %v55_v23 = vadd.f32 %v51_v13, %v37_v8  ;;  %v52_v25 = vadd.f32 %v991_v21, %v987_v19  ;;  %v53_v26 = vadd.f32 %v992_v24, %v988_v20  ;;  %v1140_v37 = vld [vmem:[%s1602_s1 + $0x10] sm:$0xff]   ;;  %v442_v38 = vld [vmem:[%s1603_s2] sm:$0xff]  ;;  %v443_v40 = vld [vmem:[%s1603_s2 + $0x8] sm:$0xff] }
   0x8   :  { %452 = vperm.xlu1 %1136, %v442_v38   ;;  %v444_v39 = vld [vmem:[%s1603_s2 + $0x10] sm:$0xff]  ;;  %v447_v41 = vld [vmem:[%s1603_s2 + $0x28] sm:$0xff]  ;;  %v1141_v42 = vld [vmem:[%s1602_s1 + $0x18] sm:$0xff]  }
   0x9   :  { %v58_v28 = vmul.f32 0.25, %v54_v22  ;;  %v59_v29 = vmul.f32 0.25, %v55_v23  ;;  %v56_v30 = vadd.f32 %v52_v25, %v38_v17  ;;  %v57_v31 = vadd.f32 %v53_v26, %v39_v18  ;;  %462 = vperm.xlu0 %1137, %v444_v39   ;;  %v445_v43 = vld [vmem:[%s1603_s2 + $0x18] sm:$0xff]  ;;  %v1142_v44 = vld [vmem:[%s1602_s1 + $0x20] sm:$0xff]   ;;  %v1143_v46 = vld [vmem:[%s1602_s1 + $0x28] sm:$0xff]  }
   0xa   :  { %v446_v45 = vld [vmem:[%s1603_s2 + $0x20] sm:$0xff]  ;;  %v1144_v47 = vld [vmem:[%s1602_s1 + $0x30] sm:$0xff]   ;;  %v1145_v48 = vld [vmem:[%s1602_s1 + $0x38] sm:$0xff]  }
   0xb   :  { %v88_v32 = vpack.c.bf16 %v59_v29, %v58_v28  ;;  %v60_v33 = vmul.f32 0.25, %v56_v30  ;;  %v61_v34 = vmul.f32 0.25, %v57_v31  ;;  %v1146_v49 = vld [vmem:[%s1602_s1 + $0x40] sm:$0xff]   ;;  %v1147_v50 = vld [vmem:[%s1602_s1 + $0x48] sm:$0xff]   ;;  %v1148_v51 = vld [vmem:[%s1602_s1 + $0x50] sm:$0xff]  }
   0xc   :  { %457 = vperm.xlu1 %1136, %v443_v40   ;;  %v1149_v52 = vld [vmem:[%s1602_s1 + $0x58] sm:$0xff]   ;;  %s1164_s1 = smov 127   ;;  %v448_v9 = vld [vmem:[%s1603_s2 + $0x30] sm:$0xff]  ;;  %v888_v15 = vld [vmem:[%s1604_s4] sm:$0xff] }
   0xd   :  { %1073 = vmatprep.subr.bf16.mxu0 %v88_v32  ;;  %v89_v35 = vpack.c.bf16 %v61_v34, %v60_v33  ;;  %477 = vperm.xlu0 %1137, %v447_v41   ;;  %v449_v10 = vld [vmem:[%s1603_s2 + $0x38] sm:$0xff]  ;;  %v889_v16 = vld [vmem:[%s1604_s4 + $0x8] sm:$0xff]  ;;  %v890_v17 = vld [vmem:[%s1604_s4 + $0x10] sm:$0xff] }
   0xe   :  { %1074 = vmatpush3.bf16.msra.mxu0 %v88_v32  ;;  %v891_v18 = vld [vmem:[%s1604_s4 + $0x18] sm:$0xff]  ;;  %v892_v19 = vld [vmem:[%s1604_s4 + $0x20] sm:$0xff]  ;;  %v893_v20 = vld [vmem:[%s1604_s4 + $0x28] sm:$0xff] }
   0xf   :  { %1075 = vmatprep.subr.bf16.mxu0 %v89_v35  ;;  %v894_v21 = vld [vmem:[%s1604_s4 + $0x30] sm:$0xff]  ;;  %v895_v22 = vld [vmem:[%s1604_s4 + $0x38] sm:$0xff]  ;;  %v1150_v23 = vld [vmem:[%s1605_s3] sm:$0xff]  }
  0x10   :  { %467 = vperm.xlu1 %1136, %v445_v43   ;;  %1109 = vmatprep.mubr.msk.bf16.mxu1 %vm610_vm1, %v1150_v23 }
  0x12   :  { %1076 = vmatpush3.bf16.msra.mxu0 %v89_v35 }
  0x14   :  { %472 = vperm.xlu1 %1136, %v446_v45  }
  0x15   :  { %1078 = vmatmul.mubr.msk.bf16.vlgmr.msra.gmra.mrb[0].mxu0 %vm150_vm0, %v1139_v36  ;;  %v1396_v36 = vld [vmem:[%s1606_s5] ss:$0 sm:$0xff] }
  0x16   :  { %1081 = vmatprep.mubr.msk.bf16.mxu0 %vm150_vm0, %v1140_v37 }
  0x1d   :  { %1082 = vmatmul.mubr.msk.bf16.gmra.mrb[4].mxu0 %vm150_vm0, %v1141_v42 }
  0x1e   :  { %1085 = vmatprep.mubr.msk.bf16.mxu0 %vm150_vm0, %v1142_v44  ;;  %v1406_v44 = vld [vmem:[%s1607_s6] ss:$0 sm:$0xff] }
  0x25   :  { %1086 = vmatmul.mubr.msk.bf16.gmra.mrb[8].mxu0 %vm150_vm0, %v1143_v46 }
  0x26   :  { %1089 = vmatprep.mubr.msk.bf16.mxu0 %vm150_vm0, %v1144_v47 }
  0x2d   :  { %1090 = vmatmul.mubr.msk.bf16.gmra.mrb[12].mxu0 %vm150_vm0, %v1145_v48 }
  0x2e   :  { %1093 = vmatprep.mubr.msk.bf16.mxu0 %vm150_vm0, %v1146_v49 }
  0x35   :  { %1094 = vmatmul.mubr.msk.bf16.gmra.mrb[16].mxu0 %vm150_vm0, %v1147_v50 }
  0x36   :  { %1097 = vmatprep.mubr.msk.bf16.mxu0 %vm150_vm0, %v1148_v51 }
  0x3d   :  { %1098 = vmatmul.mubr.msk.bf16.gmra.mrb[20].mxu0 %vm150_vm0, %v1149_v52 }
  0x87   :  { %v453_v25 = vpop.permute.xlu1 %452 }
  0x88   :  { %v463_v24 = vpop.permute.xlu0 %462 }
  0x8b   :  { %v458_v27 = vpop.permute.xlu1 %457 }
  0x8c   :  { %v1385_v26 = vpop.permute.xlu0 %477 }
  0x8f   :  { %v468_v29 = vpop.permute.xlu1 %467 }
  0x93   :  { %v1387_v31 = vpop.permute.xlu1 %472 }
  0xe8   :  { %v1079_v53 = vpop.f32.mrb[0].mxu0 }
  0xe9   :  { %328 = vrot.lane.b32.xlu0 %v1079_v53, %s1163_s21  ;;  %v221_v54 = vpop.f32.mrb[1].mxu0 }
  0xea   :  { %v1080_v55 = vpop.f32.mrb[2].mxu0 }
  0xeb   :  { %330 = vrot.lane.b32.xlu1 %v1080_v55, %s1163_s21  ;;  %v224_v56 = vpop.f32.mrb[3].mxu0 }
  0xed   :  { %324 = vrot.lane.b32.xlu0 %v221_v54, %s1163_s21 }
  0xf0   :  { %v1083_v57 = vpop.f32.mrb[4].mxu0 }
  0xf1   :  { %326 = vrot.lane.b32.xlu0 %v224_v56, %s1163_s21  ;;  %336 = vrot.lane.b32.xlu1 %v1083_v57, %s1163_s21  ;;  %v237_v58 = vpop.f32.mrb[5].mxu0 }
  0xf2   :  { %v1084_v59 = vpop.f32.mrb[6].mxu0 }
  0xf3   :  { %v240_v60 = vpop.f32.mrb[7].mxu0 }
  0xf5   :  { %332 = vrot.lane.b32.xlu1 %v237_v58, %s1163_s21  ;;  %338 = vrot.lane.b32.xlu0 %v1084_v59, %s1163_s21 }
  0xf8   :  { %v1326_v61 = vpop.f32.mrb[8].mxu0 }
  0xf9   :  { %334 = vrot.lane.b32.xlu0 %v240_v60, %s1163_s21  ;;  %v1329_v62 = vpop.f32.mrb[9].mxu0 }
  0xfa   :  { %v1331_v63 = vpop.f32.mrb[10].mxu0 }
  0xfb   :  { %v1333_v0 = vpop.f32.mrb[11].mxu0 }
 0x100   :  { %v1335_v1 = vpop.f32.mrb[12].mxu0 }
 0x101   :  { %v1337_v2 = vpop.f32.mrb[13].mxu0 }
 0x102   :  { %v1339_v3 = vpop.f32.mrb[14].mxu0 }
 0x103   :  { %v1341_v4 = vpop.f32.mrb[15].mxu0 }
 0x108   :  { %v1095_v5 = vpop.f32.mrb[16].mxu0 }
 0x109   :  { %369 = vrot.lane.b32.xlu1 %v1095_v5, %s1164_s1  ;;  %v285_v6 = vpop.f32.mrb[17].mxu0 }
 0x10a   :  { %365 = vrot.lane.b32.xlu0 %v285_v6, %s1164_s1  ;;  %v1096_v7 = vpop.f32.mrb[18].mxu0 }
 0x10b   :  { %v288_v8 = vpop.f32.mrb[19].mxu0 }
 0x10d   :  { %367 = vrot.lane.b32.xlu1 %v288_v8, %s1164_s1 }
 0x10e   :  { %371 = vrot.lane.b32.xlu0 %v1096_v7, %s1164_s1 }
 0x110   :  { %v1099_v11 = vpop.f32.mrb[20].mxu0 }
 0x111   :  { %482 = vperm.xlu1 %1136, %v448_v9   ;;  %v301_v12 = vpop.f32.mrb[21].mxu0 }
 0x112   :  { %487 = vperm.xlu0 %1137, %v449_v10   ;;  %v1100_v13 = vpop.f32.mrb[22].mxu0 }
 0x113   :  { %v304_v14 = vpop.f32.mrb[23].mxu0 }
 0x115   :  { %373 = vrot.lane.b32.xlu1 %v301_v12, %s1164_s1 }
 0x116   :  { %375 = vrot.lane.b32.xlu0 %v304_v14, %s1164_s1 }
 0x119   :  { %377 = vrot.lane.b32.xlu1 %v1099_v11, %s1164_s1 }
 0x11a   :  { %379 = vrot.lane.b32.xlu0 %v1100_v13, %s1164_s1 }
 0x11d   :  { %898 = vperm.xlu1 %1136, %v888_v15  }
 0x11e   :  { %903 = vperm.xlu0 %1137, %v889_v16  }
 0x121   :  { %908 = vperm.xlu1 %1136, %v890_v17  }
 0x122   :  { %913 = vperm.xlu0 %1137, %v891_v18  }
 0x125   :  { %918 = vperm.xlu1 %1136, %v892_v19  }
 0x126   :  { %923 = vperm.xlu0 %1137, %v893_v20  }
 0x129   :  { %928 = vperm.xlu1 %1136, %v894_v21  }
 0x12a   :  { %933 = vperm.xlu0 %1137, %v895_v22  }
 0x15b   :  { %v329_v28 = vpop.permute.xlu0 %328 }
 0x15c   :  { %v351_v37 = vsel %vm348_vm2, 0.0, %v329_v28 }
 0x15d   :  { %v331_v33 = vpop.permute.xlu1 %330  ;;  %v406_v41 = vmul.f32 %v1396_v36, %v351_v37 }
 0x15e   :  { %v352_v45 = vsel %vm348_vm2, 0.0, %v331_v33 }
 0x15f   :  { %v325_v30 = vpop.permute.xlu0 %324  ;;  %v414_v49 = vadd.f32 %v1326_v61, %v406_v41  ;;  %v407_v53 = vmul.f32 %v1396_v36, %v352_v45 }
 0x160   :  { %v349_v38 = vsel %vm348_vm2, 0.0, %v325_v30 }
 0x161   :  { %v404_v42 = vmul.f32 %v1396_v36, %v349_v38  ;;  %v415_v7 = vadd.f32 %v1331_v63, %v407_v53 }
 0x163   :  { %v327_v32 = vpop.permute.xlu0 %326  ;;  %v1389_v34 = vpop.permute.xlu1 %336  ;;  %v412_v54 = vadd.f32 %v404_v42, %v1329_v62 }
 0x164   :  { %v350_v43 = vsel %vm348_vm2, 0.0, %v327_v32  ;;  %v355_v28 = vsel %vm348_vm2, 0.0, %v1389_v34 }
 0x165   :  { %v405_v50 = vmul.f32 %v1396_v36, %v350_v43  ;;  %v410_v38 = vmul.f32 %v1396_v36, %v355_v28 }
 0x167   :  { %v1391_v35 = vpop.permute.xlu0 %338  ;;  %v333_v39 = vpop.permute.xlu1 %332  ;;  %v413_v61 = vadd.f32 %v405_v50, %v1333_v0 }
 0x168   :  { %v353_v22 = vsel %vm348_vm2, 0.0, %v333_v39  ;;  %v356_v30 = vsel %vm348_vm2, 0.0, %v1391_v35 }
 0x169   :  { %v411_v42 = vmul.f32 %v1396_v36, %v356_v30 }
 0x16b   :  { %v335_v40 = vpop.permute.xlu0 %334 }
 0x16c   :  { %v354_v23 = vsel %vm348_vm2, 0.0, %v335_v40 }
 0x17b   :  { %v370_v46 = vpop.permute.xlu1 %369 }
 0x17c   :  { %v392_v47 = vsel %vm389_vm3, %v370_v46, 0.0  ;;  %v366_v48 = vpop.permute.xlu0 %365 }
 0x17d   :  { %v428_v51 = vmul.f32 %v1406_v44, %v392_v47  ;;  %v390_v52 = vsel %vm389_vm3, %v366_v48, 0.0 }
 0x17e   :  { %v426_v55 = vmul.f32 %v1406_v44, %v390_v52  ;;  %v419_v52 = vadd.f32 %v1339_v3, %v411_v42 }
 0x17f   :  { %v436_v56 = vadd.f32 %v428_v51, %v414_v49  ;;  %v368_v57 = vpop.permute.xlu1 %367  ;;  %v418_v49 = vadd.f32 %v1335_v1, %v410_v38 }
 0x180   :  { %v434_v58 = vadd.f32 %v426_v55, %v412_v54  ;;  %v391_v59 = vsel %vm389_vm3, %v368_v57, 0.0  ;;  %v372_v60 = vpop.permute.xlu0 %371 }
 0x181   :  { %v427_v5 = vmul.f32 %v1406_v44, %v391_v59  ;;  %v393_v6 = vsel %vm389_vm3, %v372_v60, 0.0  ;;  %v492_v8 = vadd.f32 %v463_v24, %v436_v56 }
 0x182   :  { %v490_v9 = vadd.f32 %v453_v25, %v434_v58  ;;  %v429_v62 = vmul.f32 %v1406_v44, %v393_v6 }
 0x183   :  { %v435_v10 = vadd.f32 %v427_v5, %v413_v61  ;;  %v508_v15 = vmul.f32 0.1, %v492_v8  ;;  %vm500_vm6 = vcmp.gt.f32.partialorder %v492_v8, 0.0 }
 0x184   :  { %v437_v11 = vadd.f32 %v429_v62, %v415_v7  ;;  %v506_v13 = vmul.f32 0.1, %v490_v9  ;;  %vm498_vm4 = vcmp.gt.f32.partialorder %v490_v9, 0.0  ;;  %v1151_v7 = vld [vmem:[%s1605_s3 + $0x8] sm:$0xff]   ;;  %v1154_v62 = vld [vmem:[%s1605_s3 + $0x20] sm:$0xff]  }
 0x185   :  { %v491_v12 = vadd.f32 %v458_v27, %v435_v10  ;;  %v516_v63 = vsel %vm500_vm6, %v492_v8, %v508_v15  ;;  %v408_v27 = vmul.f32 %v1396_v36, %v353_v22  ;;  %v1152_v8 = vld [vmem:[%s1605_s3 + $0x10] sm:$0xff]   ;;  %v1155_v10 = vld [vmem:[%s1605_s3 + $0x28] sm:$0xff]  }
 0x186   :  { %v493_v14 = vadd.f32 %v468_v29, %v437_v11  ;;  %v514_v17 = vsel %vm498_vm4, %v490_v9, %v506_v13  ;;  %v409_v29 = vmul.f32 %v1396_v36, %v354_v23  ;;  %v1153_v9 = vld [vmem:[%s1605_s3 + $0x18] sm:$0xff]   ;;  %v1156_v11 = vld [vmem:[%s1605_s3 + $0x30] sm:$0xff]   ;;  %v1158_v13 = vld [vmem:[%s1605_s3 + $0x40] sm:$0xff]  }
 0x187   :  { %vm499_vm5 = vcmp.gt.f32.partialorder %v491_v12, 0.0  ;;  %v507_v16 = vmul.f32 0.1, %v491_v12  ;;  %v416_v39 = vadd.f32 %v408_v27, %v1337_v2  ;;  %v1160_v15 = vld [vmem:[%s1605_s3 + $0x50] sm:$0xff]  }
 0x188   :  { %vm501_vm7 = vcmp.gt.f32.partialorder %v493_v14, 0.0  ;;  %v509_v0 = vmul.f32 0.1, %v493_v14  ;;  %v417_v34 = vadd.f32 %v409_v29, %v1341_v4 }
 0x189   :  { %v515_v18 = vsel %vm499_vm5, %v491_v12, %v507_v16  ;;  %v1157_v12 = vld [vmem:[%s1605_s3 + $0x38] sm:$0xff]  }
 0x18a   :  { %v546_v19 = vpack.c.bf16 %v515_v18, %v514_v17  ;;  %v517_v20 = vsel %vm501_vm7, %v493_v14, %v509_v0  ;;  %v1159_v14 = vld [vmem:[%s1605_s3 + $0x48] sm:$0xff]   ;;  %v1161_v16 = vld [vmem:[%s1605_s3 + $0x58] sm:$0xff]  }
 0x18b   :  { %v547_v21 = vpack.c.bf16 %v517_v20, %v516_v63 }
 0x18c   :  { %1101 = vmatprep.subr.bf16.mxu1 %v546_v19 }
 0x18d   :  { %1102 = vmatpush3.bf16.msra.mxu1 %v546_v19 }
 0x18e   :  { %1103 = vmatprep.subr.bf16.mxu1 %v547_v21 }
 0x190   :  { %v483_v24 = vpop.permute.xlu1 %482 }
 0x191   :  { %v488_v25 = vpop.permute.xlu0 %487  ;;  %1104 = vmatpush3.bf16.msra.mxu1 %v547_v21 }
 0x194   :  { %v374_v32 = vpop.permute.xlu1 %373 }
 0x195   :  { %v394_v33 = vsel %vm389_vm3, %v374_v32, 0.0  ;;  %v376_v37 = vpop.permute.xlu0 %375 }
 0x196   :  { %v430_v40 = vmul.f32 %v1406_v44, %v394_v33  ;;  %v395_v41 = vsel %vm389_vm3, %v376_v37, 0.0 }
 0x197   :  { %v431_v43 = vmul.f32 %v1406_v44, %v395_v41 }
 0x198   :  { %v438_v45 = vadd.f32 %v430_v40, %v416_v39  ;;  %v378_v35 = vpop.permute.xlu1 %377 }
 0x199   :  { %v439_v46 = vadd.f32 %v431_v43, %v417_v34  ;;  %v396_v47 = vsel %vm389_vm3, %v378_v35, 0.0  ;;  %v380_v48 = vpop.permute.xlu0 %379 }
 0x19a   :  { %v494_v2 = vadd.f32 %v1387_v31, %v438_v45  ;;  %v432_v50 = vmul.f32 %v1406_v44, %v396_v47  ;;  %v397_v51 = vsel %vm389_vm3, %v380_v48, 0.0 }
 0x19b   :  { %v495_v4 = vadd.f32 %v1385_v26, %v439_v46  ;;  %v433_v53 = vmul.f32 %v1406_v44, %v397_v51 }
 0x19c   :  { %v440_v54 = vadd.f32 %v432_v50, %v418_v49  ;;  %vm502_vm8 = vcmp.gt.f32.partialorder %v494_v2, 0.0  ;;  %v510_v55 = vmul.f32 0.1, %v494_v2  ;;  %v899_v43 = vpop.permute.xlu1 %898 }
 0x19d   :  { %v441_v56 = vadd.f32 %v433_v53, %v419_v52  ;;  %vm503_vm9 = vcmp.gt.f32.partialorder %v495_v4, 0.0  ;;  %v511_v57 = vmul.f32 0.1, %v495_v4  ;;  %v1517_v45 = vpop.permute.xlu0 %903 }
 0x19e   :  { %v496_v58 = vadd.f32 %v483_v24, %v440_v54  ;;  %v518_v1 = vsel %vm502_vm8, %v494_v2, %v510_v55 }
 0x19f   :  { %v497_v59 = vadd.f32 %v488_v25, %v441_v56  ;;  %v519_v31 = vsel %vm503_vm9, %v495_v4, %v511_v57 }
 0x1a0   :  { %v548_v60 = vpack.c.bf16 %v519_v31, %v518_v1  ;;  %vm504_vm10 = vcmp.gt.f32.partialorder %v496_v58, 0.0  ;;  %v512_v61 = vmul.f32 0.1, %v496_v58  ;;  %v909_v35 = vpop.permute.xlu1 %908 }
 0x1a1   :  { %vm505_vm11 = vcmp.gt.f32.partialorder %v497_v59, 0.0  ;;  %v513_v5 = vmul.f32 0.1, %v497_v59  ;;  %v914_v46 = vpop.permute.xlu0 %913 }
 0x1a2   :  { %1105 = vmatprep.subr.bf16.mxu1 %v548_v60  ;;  %v520_v3 = vsel %vm504_vm10, %v496_v58, %v512_v61 }
 0x1a3   :  { %1106 = vmatpush3.bf16.msra.mxu1 %v548_v60  ;;  %v521_v26 = vsel %vm505_vm11, %v497_v59, %v513_v5 }
 0x1a4   :  { %v549_v6 = vpack.c.bf16 %v521_v26, %v520_v3  ;;  %v1519_v47 = vpop.permute.xlu1 %918 }
 0x1a5   :  { %v1521_v48 = vpop.permute.xlu0 %923 }
 0x1a6   :  { %1107 = vmatprep.subr.bf16.mxu1 %v549_v6 }
 0x1a7   :  { %1108 = vmatpush3.bf16.msra.mxu1 %v549_v6 }
 0x1a8   :  { %v1523_v49 = vpop.permute.xlu1 %928 }
 0x1a9   :  { %v1525_v2 = vpop.permute.xlu0 %933 }
 0x1aa   :  { %1110 = vmatmul.mubr.msk.bf16.vlgmr.msra.gmra.mrb[0].mxu1 %vm610_vm1, %v1151_v7 }
 0x1ab   :  { %1113 = vmatprep.mubr.msk.bf16.mxu1 %vm610_vm1, %v1152_v8 }
 0x1b2   :  { %1114 = vmatmul.mubr.msk.bf16.gmra.mrb[4].mxu1 %vm610_vm1, %v1153_v9 }
 0x1b3   :  { %1117 = vmatprep.mubr.msk.bf16.mxu1 %vm610_vm1, %v1154_v62 }
 0x1ba   :  { %1118 = vmatmul.mubr.msk.bf16.gmra.mrb[8].mxu1 %vm610_vm1, %v1155_v10 }
 0x1bb   :  { %1121 = vmatprep.mubr.msk.bf16.mxu1 %vm610_vm1, %v1156_v11 }
 0x1c2   :  { %1122 = vmatmul.mubr.msk.bf16.gmra.mrb[12].mxu1 %vm610_vm1, %v1157_v12 }
 0x1c3   :  { %1125 = vmatprep.mubr.msk.bf16.mxu1 %vm610_vm1, %v1158_v13 }
 0x1ca   :  { %1126 = vmatmul.mubr.msk.bf16.gmra.mrb[16].mxu1 %vm610_vm1, %v1159_v14 }
 0x1cb   :  { %1129 = vmatprep.mubr.msk.bf16.mxu1 %vm610_vm1, %v1160_v15 }
 0x1d2   :  { %1130 = vmatmul.mubr.msk.bf16.gmra.mrb[20].mxu1 %vm610_vm1, %v1161_v16 }
 0x27d   :  { %v1111_v0 = vpop.f32.mrb[0].mxu1 }
 0x27e   :  { %788 = vrot.lane.b32.xlu1 %v1111_v0, %s1163_s21  ;;  %v681_v17 = vpop.f32.mrb[1].mxu1 }
 0x27f   :  { %v1112_v18 = vpop.f32.mrb[2].mxu1 }
 0x280   :  { %790 = vrot.lane.b32.xlu0 %v1112_v18, %s1163_s21  ;;  %v684_v19 = vpop.f32.mrb[3].mxu1 }
 0x282   :  { %784 = vrot.lane.b32.xlu1 %v681_v17, %s1163_s21 }
 0x284   :  { %786 = vrot.lane.b32.xlu0 %v684_v19, %s1163_s21 }
 0x285   :  { %v1115_v63 = vpop.f32.mrb[4].mxu1 }
 0x286   :  { %796 = vrot.lane.b32.xlu1 %v1115_v63, %s1163_s21  ;;  %v697_v20 = vpop.f32.mrb[5].mxu1 }
 0x287   :  { %v1116_v21 = vpop.f32.mrb[6].mxu1 }
 0x288   :  { %798 = vrot.lane.b32.xlu0 %v1116_v21, %s1163_s21  ;;  %v700_v22 = vpop.f32.mrb[7].mxu1 }
 0x28a   :  { %792 = vrot.lane.b32.xlu1 %v697_v20, %s1163_s21 }
 0x28c   :  { %794 = vrot.lane.b32.xlu0 %v700_v22, %s1163_s21 }
 0x28d   :  { %v1119_v23 = vpop.f32.mrb[8].mxu1 }
 0x28e   :  { %v713_v24 = vpop.f32.mrb[9].mxu1 }
 0x28f   :  { %v1120_v25 = vpop.f32.mrb[10].mxu1 }
 0x290   :  { %v1499_v27 = vpop.f32.mrb[11].mxu1 }
 0x295   :  { %v1501_v28 = vpop.f32.mrb[12].mxu1 }
 0x296   :  { %v1503_v29 = vpop.f32.mrb[13].mxu1 }
 0x297   :  { %v1505_v30 = vpop.f32.mrb[14].mxu1 }
 0x298   :  { %v1507_v32 = vpop.f32.mrb[15].mxu1 }
 0x29d   :  { %v1127_v33 = vpop.f32.mrb[16].mxu1 }
 0x29e   :  { %828 = vrot.lane.b32.xlu1 %v1127_v33, %s1164_s1  ;;  %v745_v37 = vpop.f32.mrb[17].mxu1 }
 0x29f   :  { %v1128_v38 = vpop.f32.mrb[18].mxu1 }
 0x2a0   :  { %830 = vrot.lane.b32.xlu0 %v1128_v38, %s1164_s1  ;;  %v748_v39 = vpop.f32.mrb[19].mxu1 }
 0x2a2   :  { %824 = vrot.lane.b32.xlu1 %v745_v37, %s1164_s1 }
 0x2a4   :  { %826 = vrot.lane.b32.xlu0 %v748_v39, %s1164_s1 }
 0x2a5   :  { %v1131_v40 = vpop.f32.mrb[20].mxu1 }
 0x2a6   :  { %v761_v41 = vpop.f32.mrb[21].mxu1 }
 0x2a7   :  { %832 = vrot.lane.b32.xlu1 %v761_v41, %s1164_s1  ;;  %v1132_v42 = vpop.f32.mrb[22].mxu1 }
 0x2a8   :  { %v764_v34 = vpop.f32.mrb[23].mxu1 }
 0x2a9   :  { %834 = vrot.lane.b32.xlu0 %v764_v34, %s1164_s1 }
 0x2ab   :  { %836 = vrot.lane.b32.xlu1 %v1131_v40, %s1164_s1 }
 0x2ad   :  { %838 = vrot.lane.b32.xlu0 %v1132_v42, %s1164_s1 }
 0x2f0   :  { %v789_v50 = vpop.permute.xlu1 %788 }
 0x2f1   :  { %v810_v55 = vsel %vm348_vm2, 0.0, %v789_v50 }
 0x2f2   :  { %v791_v51 = vpop.permute.xlu0 %790  ;;  %v858_v58 = vmul.f32 %v1396_v36, %v810_v55 }
 0x2f3   :  { %v811_v57 = vsel %vm348_vm2, 0.0, %v791_v51 }
 0x2f4   :  { %v785_v52 = vpop.permute.xlu1 %784  ;;  %v859_v31 = vmul.f32 %v1396_v36, %v811_v57  ;;  %v866_v3 = vadd.f32 %v1119_v23, %v858_v58 }
 0x2f5   :  { %v808_v1 = vsel %vm348_vm2, 0.0, %v785_v52 }
 0x2f6   :  { %v787_v4 = vpop.permute.xlu0 %786  ;;  %v856_v61 = vmul.f32 %v1396_v36, %v808_v1  ;;  %v867_v9 = vadd.f32 %v1120_v25, %v859_v31 }
 0x2f7   :  { %v809_v26 = vsel %vm348_vm2, 0.0, %v787_v4 }
 0x2f8   :  { %v797_v53 = vpop.permute.xlu1 %796  ;;  %v864_v13 = vadd.f32 %v856_v61, %v713_v24  ;;  %v857_v14 = vmul.f32 %v1396_v36, %v809_v26 }
 0x2f9   :  { %v814_v63 = vsel %vm348_vm2, 0.0, %v797_v53 }
 0x2fa   :  { %v799_v54 = vpop.permute.xlu0 %798  ;;  %v865_v25 = vadd.f32 %v857_v14, %v1499_v27  ;;  %v862_v34 = vmul.f32 %v1396_v36, %v814_v63 }
 0x2fb   :  { %v815_v33 = vsel %vm348_vm2, 0.0, %v799_v54 }
 0x2fc   :  { %v793_v56 = vpop.permute.xlu1 %792 }
 0x2fd   :  { %v812_v62 = vsel %vm348_vm2, 0.0, %v793_v56 }
 0x2fe   :  { %v795_v59 = vpop.permute.xlu0 %794  ;;  %v860_v20 = vmul.f32 %v1396_v36, %v812_v62 }
 0x2ff   :  { %v813_v16 = vsel %vm348_vm2, 0.0, %v795_v59 }
 0x300   :  { %v861_v37 = vmul.f32 %v1396_v36, %v813_v16 }
 0x302   :  { %v869_v53 = vadd.f32 %v861_v37, %v1507_v32 }
 0x310   :  { %v829_v60 = vpop.permute.xlu1 %828 }
 0x311   :  { %v850_v5 = vsel %vm389_vm3, %v829_v60, 0.0 }
 0x312   :  { %v874_v6 = vmul.f32 %v1406_v44, %v850_v5  ;;  %v831_v7 = vpop.permute.xlu0 %830 }
 0x313   :  { %v851_v8 = vsel %vm389_vm3, %v831_v7, 0.0 }
 0x314   :  { %v882_v10 = vadd.f32 %v874_v6, %v866_v3  ;;  %v875_v11 = vmul.f32 %v1406_v44, %v851_v8  ;;  %v825_v12 = vpop.permute.xlu1 %824 }
 0x315   :  { %v848_v15 = vsel %vm389_vm3, %v825_v12, 0.0 }
 0x316   :  { %v938_v0 = vadd.f32 %v909_v35, %v882_v10  ;;  %v883_v17 = vadd.f32 %v875_v11, %v867_v9  ;;  %v872_v18 = vmul.f32 %v1406_v44, %v848_v15  ;;  %v827_v19 = vpop.permute.xlu0 %826  ;;  %v868_v35 = vadd.f32 %v860_v20, %v1503_v29 }
 0x317   :  { %v849_v21 = vsel %vm389_vm3, %v827_v19, 0.0 }
 0x318   :  { %vm946_vm13 = vcmp.gt.f32.partialorder %v938_v0, 0.0  ;;  %v954_v22 = vmul.f32 0.1, %v938_v0  ;;  %v939_v23 = vadd.f32 %v914_v46, %v883_v17  ;;  %v880_v24 = vadd.f32 %v872_v18, %v864_v13 }
 0x319   :  { %v873_v38 = vmul.f32 %v1406_v44, %v849_v21  ;;  %v833_v39 = vpop.permute.xlu1 %832 }
 0x31a   :  { %v962_v40 = vsel %vm946_vm13, %v938_v0, %v954_v22  ;;  %vm947_vm14 = vcmp.gt.f32.partialorder %v939_v23, 0.0  ;;  %v955_v41 = vmul.f32 0.1, %v939_v23  ;;  %v936_v42 = vadd.f32 %v899_v43, %v880_v24 }
 0x31b   :  { %971 = vst.msk [vmem:[%s1608_s7 + $0x10] sm:$0xff] %vm968_vm12, %v962_v40  ;;  %v881_v27 = vadd.f32 %v873_v38, %v865_v25  ;;  %v852_v46 = vsel %vm389_vm3, %v833_v39, 0.0  ;;  %v835_v50 = vpop.permute.xlu0 %834  ;;  %v863_v43 = vmul.f32 %v1396_v36, %v815_v33  ;;  %v870_v36 = vadd.f32 %v1501_v28, %v862_v34 }
 0x31c   :  { %v963_v51 = vsel %vm947_vm14, %v939_v23, %v955_v41  ;;  %vm944_vm15 = vcmp.gt.f32.partialorder %v936_v42, 0.0  ;;  %v952_v52 = vmul.f32 0.1, %v936_v42  ;;  %v876_v4 = vmul.f32 %v1406_v44, %v852_v46 }
 0x31d   :  { %972 = vst.msk [vmem:[%s1608_s7 + $0x18] sm:$0xff] %vm968_vm12, %v963_v51  ;;  %v937_v29 = vadd.f32 %v1517_v45, %v881_v27  ;;  %v853_v54 = vsel %vm389_vm3, %v835_v50, 0.0  ;;  %v837_v55 = vpop.permute.xlu1 %836  ;;  %v871_v5 = vadd.f32 %v1505_v30, %v863_v43 }
 0x31e   :  { %v960_v56 = vsel %vm944_vm15, %v936_v42, %v952_v52  ;;  %v884_v57 = vadd.f32 %v876_v4, %v868_v35  ;;  %v877_v58 = vmul.f32 %v1406_v44, %v853_v54  ;;  %v854_v1 = vsel %vm389_vm3, %v837_v55, 0.0 }
 0x31f   :  { %969 = vst.msk [vmem:[%s1608_s7] sm:$0xff] %vm968_vm12, %v960_v56  ;;  %vm945_vm0 = vcmp.gt.f32.partialorder %v937_v29, 0.0  ;;  %v953_v32 = vmul.f32 0.1, %v937_v29  ;;  %v878_v45 = vmul.f32 %v1406_v44, %v854_v1  ;;  %v839_v59 = vpop.permute.xlu0 %838 }
 0x320   :  { %v940_v31 = vadd.f32 %v1519_v47, %v884_v57  ;;  %v885_v60 = vadd.f32 %v877_v58, %v869_v53  ;;  %v855_v61 = vsel %vm389_vm3, %v839_v59, 0.0 }
 0x321   :  { %v961_v3 = vsel %vm945_vm0, %v937_v29, %v953_v32  ;;  %v886_v26 = vadd.f32 %v878_v45, %v870_v36  ;;  %v879_v28 = vmul.f32 %v1406_v44, %v855_v61 }
 0x322   :  { %970 = vst.msk [vmem:[%s1608_s7 + $0x8] sm:$0xff] %vm968_vm12, %v961_v3  ;;  %vm948_vm1 = vcmp.gt.f32.partialorder %v940_v31, 0.0  ;;  %v956_v6 = vmul.f32 0.1, %v940_v31  ;;  %v941_v7 = vadd.f32 %v1521_v48, %v885_v60 }
 0x323   :  { %v942_v47 = vadd.f32 %v1523_v49, %v886_v26  ;;  %v887_v8 = vadd.f32 %v879_v28, %v871_v5 }
 0x324   :  { %v964_v9 = vsel %vm948_vm1, %v940_v31, %v956_v6  ;;  %vm949_vm2 = vcmp.gt.f32.partialorder %v941_v7, 0.0  ;;  %v957_v62 = vmul.f32 0.1, %v941_v7 }
 0x325   :  { %973 = vst.msk [vmem:[%s1608_s7 + $0x20] sm:$0xff] %vm968_vm12, %v964_v9  ;;  %vm950_vm3 = vcmp.gt.f32.partialorder %v942_v47, 0.0  ;;  %v958_v44 = vmul.f32 0.1, %v942_v47  ;;  %v943_v30 = vadd.f32 %v1525_v2, %v887_v8 }
 0x326   :  { %v965_v10 = vsel %vm949_vm2, %v941_v7, %v957_v62 }
 0x327   :  { %974 = vst.msk [vmem:[%s1608_s7 + $0x28] sm:$0xff] %vm968_vm12, %v965_v10  ;;  %v966_v48 = vsel %vm950_vm3, %v942_v47, %v958_v44  ;;  %vm951_vm4 = vcmp.gt.f32.partialorder %v943_v30, 0.0  ;;  %v959_v49 = vmul.f32 0.1, %v943_v30 }
 0x328   :  { %975 = vst.msk [vmem:[%s1608_s7 + $0x30] sm:$0xff] %vm968_vm12, %v966_v48 }
 0x329   :  { %v967_v11 = vsel %vm951_vm4, %v943_v30, %v959_v49 }
 0x32a   :  { %976 = vst.msk [vmem:[%s1608_s7 + $0x38] sm:$0xff] %vm968_vm12, %v967_v11 }

</bundles_post_ra>
